<compile_context>
chip_gen: v7x
topology: tpu7x:2x2x1
jax: 0.10.0
libtpu: 0.0.40
codegen_flags: <defaults>
</compile_context>

<pallas_src>
import functools

import jax
import jax.numpy as jnp
from jax.experimental import pallas as pl
from jax.experimental.pallas import tpu as pltpu

_LANE = 128
_SUBLANE = 8


def _round_up(x, m):
    return ((x + m - 1) // m) * m


def _device_supports_bf16_vpu():
    """True on chips with bf16 VPU/EUP (v6e, v7x).  Conservative default: False."""
    try:
        kind = jax.devices()[0].device_kind.lower()
    except Exception:
        return False
    return any(t in kind for t in ("v6", "v7", "tpu7"))


def _make_mlp_kernel(num_layers: int, hidden_bf16: bool, out_dtype):
    """Kernel computing sigmoid(...sigmoid(x@W1+b1)...@Wf+bf) for one batch tile.

    refs = (x_ref, W1, b1, ..., Wn, bn, out_ref); weights are bf16 (in, out),
    biases are f32 (1, out).  All matmuls accumulate in f32 on the MXU.
    """

    def kernel(*refs):
        x_ref = refs[0]
        out_ref = refs[-1]
        params = refs[1:-1]

        h = x_ref[...].astype(jnp.bfloat16)  # bf16 MXU operand
        for i in range(num_layers):
            w = params[2 * i][...]       # bf16 (in, out), VMEM-resident
            b = params[2 * i + 1][...]   # f32  (1, out),  VMEM-resident
            z = jnp.dot(h, w, preferred_element_type=jnp.float32) + b
            if i == num_layers - 1:
                # Final layer: exact sigmoid in f32, cast to requested out dtype.
                out_ref[...] = jax.nn.sigmoid(z).astype(out_dtype)
            elif hidden_bf16:
                # v6e/v7x: bf16 VPU/EUP — sigmoid in bf16; result is already the
                # next layer's MXU operand (half the elementwise work / live bytes).
                h = jax.nn.sigmoid(z.astype(jnp.bfloat16))
            else:
                # f32 elementwise path (e.g. v5e): 1/(1+e^-z) with the divide on
                # the EUP slot via approx reciprocal, then downcast for the MXU.
                h = pl.reciprocal(1.0 + jnp.exp(-z), approx=True).astype(jnp.bfloat16)

    return kernel


def prepare_params(params, hidden_count):
    """Pad + cast parameters ONCE (hoisted out of the forward path).

    params = {'lin': (W, b), 'lin2': (W, b), ..., 'linFinal': (W, b)} with
    weights in (in, out) layout, biases (1, out).
    Returns (flat_params, tag_count) where flat_params = (W1,b1,...,Wf,bf):
    weights bf16 with output columns padded to 128 lanes and input rows padded
    to the previous layer's padded width; biases f32 (1, out_padded).
    """
    if not (0 < hidden_count <= 4):
        # TODO(synk): PyTorch returns the string 'n/a' here; raise instead.
        raise ValueError("hiddenCount must be in 1..4")

    layer_names = ["lin", "lin2", "lin3", "lin4"][:hidden_count] + ["linFinal"]
    flat = []
    in_dim = params["lin"][0].shape[0]  # feature count, kept UNPADDED
    for name in layer_names:
        w, b = params[name]
        w_in, w_out = w.shape
        out_p = _round_up(w_out, _LANE)
        w_pad = jnp.pad(
            w.astype(jnp.float32), ((0, in_dim - w_in), (0, out_p - w_out))
        ).astype(jnp.bfloat16)
        b_pad = jnp.pad(
            jnp.asarray(b, jnp.float32).reshape(1, -1), ((0, 0), (0, out_p - w_out))
        )
        flat.extend([w_pad, b_pad])
        in_dim = out_p
    tag_count = params["linFinal"][0].shape[1]
    return tuple(flat), tag_count


def my_classifier_forward(
    batch_features,
    flat_params,
    *,
    hidden_count,
    tag_count,
    batch_tile_max=2048,
    hidden_bf16=False,
    out_dtype=jnp.float32,
):
    """flat_params from prepare_params().  Returns (batch, tag_count) in out_dtype."""
    if not (0 < hidden_count <= 4):
        # TODO(synk): PyTorch returns the string 'n/a' here; raise instead.
        raise ValueError("hiddenCount must be in 1..4")
    num_layers = len(flat_params) // 2
    assert num_layers == hidden_count + 1

    batch, feat = batch_features.shape
    if batch == 0:  # degenerate input guard
        return jnp.zeros((0, tag_count), out_dtype)

    tag_p = flat_params[-1].shape[1]  # padded (lane-dense) final width

    x = batch_features.astype(jnp.float32)
    # Pad batch only up to a sublane multiple (<= 7 rows); NOT up to the tile.
    batch_p = _round_up(batch, _SUBLANE)
    if batch_p != batch:
        x = jnp.pad(x, ((0, batch_p - batch), (0, 0)))

    # Large tile to amortize per-step overhead, but capped at ceil(batch/2) so
    # there are >= 2 grid steps whenever there is enough work (v7x megacore).
    batch_tile = max(
        _SUBLANE, min(batch_tile_max, _round_up(pl.cdiv(batch_p, 2), _SUBLANE))
    )
    # Partial last block: OOB reads are garbage-but-unused (rows independent),
    # OOB writes are dropped.
    grid = (pl.cdiv(batch_p, batch_tile),)

    # x block: last dim == full array dim, so no 128-lane padding required.
    in_specs = [pl.BlockSpec((batch_tile, feat), lambda i: (i, 0))]
    for p in flat_params:
        # Constant (0, 0) block index -> weights/biases stay VMEM-resident for
        # the whole grid (read from HBM once).  The lambda intentionally does
        # NOT capture `p`; do not change this or residency breaks.
        in_specs.append(pl.BlockSpec(p.shape, lambda i: (0, 0)))
    out_spec = pl.BlockSpec((batch_tile, tag_p), lambda i: (i, 0))

    kernel = _make_mlp_kernel(num_layers, hidden_bf16, out_dtype)

    out = pl.pallas_call(
        kernel,
        out_shape=jax.ShapeDtypeStruct((batch_p, tag_p), out_dtype),
        grid=grid,
        in_specs=in_specs,
        out_specs=out_spec,
        compiler_params=pltpu.CompilerParams(
            dimension_semantics=("parallel",),   # megacore sharding on v7x
            vmem_limit_bytes=32 * 1024 * 1024,   # above v5e's 16 MiB default,
                                                 # safe on v7x's 64 MiB physical
        ),
    )(x, *flat_params)

    return out[:batch, :tag_count]


def _init_linear(key, fan_in, fan_out):
    """torch.nn.Linear-style init: U(-1/sqrt(fan_in), 1/sqrt(fan_in)).
    Weight in (in, out) layout, bias as (1, out)."""
    kw, kb = jax.random.split(key)
    bound = 1.0 / jnp.sqrt(jnp.float32(fan_in))
    w = jax.random.uniform(kw, (fan_in, fan_out), jnp.float32, -bound, bound)
    b = jax.random.uniform(kb, (1, fan_out), jnp.float32, -bound, bound)
    return w, b


def init_my_classifier(key, feature_count, tag_count, hidden_size, hidden_count):
    keys = jax.random.split(key, 6)
    params = {"lin": _init_linear(keys[0], feature_count, hidden_size)}
    if hidden_count > 1:
        params["lin2"] = _init_linear(keys[1], hidden_size, hidden_size)
    if hidden_count > 2:
        params["lin3"] = _init_linear(keys[2], hidden_size, hidden_size)
    if hidden_count > 3:
        params["lin4"] = _init_linear(keys[3], hidden_size, hidden_size)
    params["linFinal"] = _init_linear(keys[4], hidden_size, tag_count)
    return params


def _reference_forward_bf16(x, params, hidden_count):
    """Same recipe as the kernel: bf16 MXU operands, f32 accumulate, sigmoid."""
    names = ["lin", "lin2", "lin3", "lin4"][:hidden_count] + ["linFinal"]
    h = x.astype(jnp.float32)
    for name in names:
        w, b = params[name]
        z = jnp.dot(
            h.astype(jnp.bfloat16),
            w.astype(jnp.bfloat16),
            preferred_element_type=jnp.float32,
        ) + jnp.asarray(b, jnp.float32).reshape(1, -1)
        h = jax.nn.sigmoid(z)
    return h


def _reference_forward_f32(x, params, hidden_count):
    names = ["lin", "lin2", "lin3", "lin4"][:hidden_count] + ["linFinal"]
    h = x.astype(jnp.float32)
    for name in names:
        w, b = params[name]
        h = jax.nn.sigmoid(h @ w + jnp.asarray(b, jnp.float32).reshape(1, -1))
    return h


if __name__ == "__main__":
    # Small, forward-consistent shapes (module has hiddenSize=128 fixed).
    batch = 8
    feature_count = 32
    hidden_size = 128
    tag_count = 16
    hidden_count = 2  # module supports 1..4; pick 2 deterministically

    key = jax.random.PRNGKey(0)
    k_params, k_x = jax.random.split(key)

    params = init_my_classifier(
        k_params, feature_count, tag_count, hidden_size, hidden_count
    )
    x = jax.random.normal(k_x, (batch, feature_count), jnp.float32)

    # Hoisted pad/cast: done exactly once, outside the forward path.
    flat_params, tag_count_ck = prepare_params(params, hidden_count)
    assert tag_count_ck == tag_count

    hidden_bf16 = _device_supports_bf16_vpu()

    fwd = jax.jit(
        functools.partial(
            my_classifier_forward,
            hidden_count=hidden_count,
            tag_count=tag_count,
            hidden_bf16=hidden_bf16,
        )
    )

    out = jax.block_until_ready(fwd(x, flat_params))
    assert out.shape == (batch, tag_count)

    # Reference with the same bf16-operand / f32-accumulate recipe (kernel may
    # additionally do bf16 hidden sigmoid or an approx EUP reciprocal, hence
    # the slightly looser tolerance).
    ref_bf16 = _reference_forward_bf16(x, params, hidden_count)
    assert jnp.allclose(out, ref_bf16, atol=1e-2, rtol=1e-2)

    # Sanity check against the full-f32 PyTorch-equivalent forward.
    ref_f32 = _reference_forward_f32(x, params, hidden_count)
    assert jnp.allclose(out, ref_f32, atol=3e-2, rtol=3e-2)

    print("KERNEL_OK")
</pallas_src>

<mosaic_0001>
module attributes {stable_mosaic.version = 11 : i64} {
  func.func @kernel(%arg0: i32, %arg1: memref<8x32xf32, #tpu.memory_space<vmem>>, %arg2: memref<32x128xbf16, #tpu.memory_space<vmem>>, %arg3: memref<1x128xf32, #tpu.memory_space<vmem>>, %arg4: memref<128x128xbf16, #tpu.memory_space<vmem>>, %arg5: memref<1x128xf32, #tpu.memory_space<vmem>>, %arg6: memref<128x128xbf16, #tpu.memory_space<vmem>>, %arg7: memref<1x128xf32, #tpu.memory_space<vmem>>, %arg8: memref<8x128xf32, #tpu.memory_space<vmem>>) attributes {dimension_semantics = [#tpu.dimension_semantics<parallel>], iteration_bounds = array<i64: 1>, scalar_prefetch = 0 : i64, scratch_operands = 0 : i64, tpu.core_type = #tpu.core_type<tc>, window_params = [{transform_indices = @transform_0, window_bounds = array<i64: 8, 32>}, {pipeline_mode = #tpu.pipeline_mode<synchronous>, transform_indices = @transform_1, window_bounds = array<i64: 32, 128>}, {pipeline_mode = #tpu.pipeline_mode<synchronous>, transform_indices = @transform_2, window_bounds = array<i64: 1, 128>}, {pipeline_mode = #tpu.pipeline_mode<synchronous>, transform_indices = @transform_3, window_bounds = array<i64: 128, 128>}, {pipeline_mode = #tpu.pipeline_mode<synchronous>, transform_indices = @transform_4, window_bounds = array<i64: 1, 128>}, {pipeline_mode = #tpu.pipeline_mode<synchronous>, transform_indices = @transform_5, window_bounds = array<i64: 128, 128>}, {pipeline_mode = #tpu.pipeline_mode<synchronous>, transform_indices = @transform_6, window_bounds = array<i64: 1, 128>}, {transform_indices = @transform_7, window_bounds = array<i64: 8, 128>}]} {
    %c0 = arith.constant 0 : index
    %c0_0 = arith.constant 0 : index
    %0 = vector.load %arg1[%c0, %c0_0] : memref<8x32xf32, #tpu.memory_space<vmem>>, vector<8x32xf32>
    %1 = arith.truncf %0 : vector<8x32xf32> to vector<8x32xbf16>
    %c0_1 = arith.constant 0 : index
    %c0_2 = arith.constant 0 : index
    %2 = vector.load %arg2[%c0_1, %c0_2] : memref<32x128xbf16, #tpu.memory_space<vmem>>, vector<32x128xbf16>
    %c0_3 = arith.constant 0 : index
    %c0_4 = arith.constant 0 : index
    %3 = vector.load %arg3[%c0_3, %c0_4] : memref<1x128xf32, #tpu.memory_space<vmem>>, vector<1x128xf32>
    %cst = arith.constant dense<0.000000e+00> : vector<8x128xf32>
    %4 = tpu.matmul %1, %2, %cst {dimension_numbers = #tpu.dot_dimension_numbers<[1], [0], [0], [1], [0, 0, 1, 1], [], []>} : vector<8x32xbf16>, vector<32x128xbf16>, vector<8x128xf32> -> vector<8x128xf32>
    %5 = vector.broadcast %3 : vector<1x128xf32> to vector<8x128xf32>
    %6 = arith.addf %4, %5 : vector<8x128xf32>
    %cst_5 = arith.constant 0.000000e+00 : f32
    %7 = vector.broadcast %cst_5 : f32 to vector<8x128xf32>
    %8 = arith.subf %7, %6 : vector<8x128xf32>
    %9 = math.exp %8 : vector<8x128xf32>
    %cst_6 = arith.constant 1.000000e+00 : f32
    %10 = vector.broadcast %cst_6 : f32 to vector<8x128xf32>
    %11 = arith.addf %10, %9 : vector<8x128xf32>
    %12 = tpu.reciprocal %11 {approx = true} : vector<8x128xf32> -> vector<8x128xf32>
    %13 = arith.truncf %12 : vector<8x128xf32> to vector<8x128xbf16>
    %c0_7 = arith.constant 0 : index
    %c0_8 = arith.constant 0 : index
    %14 = vector.load %arg4[%c0_7, %c0_8] : memref<128x128xbf16, #tpu.memory_space<vmem>>, vector<128x128xbf16>
    %c0_9 = arith.constant 0 : index
    %c0_10 = arith.constant 0 : index
    %15 = vector.load %arg5[%c0_9, %c0_10] : memref<1x128xf32, #tpu.memory_space<vmem>>, vector<1x128xf32>
    %cst_11 = arith.constant dense<0.000000e+00> : vector<8x128xf32>
    %16 = tpu.matmul %13, %14, %cst_11 {dimension_numbers = #tpu.dot_dimension_numbers<[1], [0], [0], [1], [0, 0, 1, 1], [], []>} : vector<8x128xbf16>, vector<128x128xbf16>, vector<8x128xf32> -> vector<8x128xf32>
    %17 = vector.broadcast %15 : vector<1x128xf32> to vector<8x128xf32>
    %18 = arith.addf %16, %17 : vector<8x128xf32>
    %cst_12 = arith.constant 0.000000e+00 : f32
    %19 = vector.broadcast %cst_12 : f32 to vector<8x128xf32>
    %20 = arith.subf %19, %18 : vector<8x128xf32>
    %21 = math.exp %20 : vector<8x128xf32>
    %cst_13 = arith.constant 1.000000e+00 : f32
    %22 = vector.broadcast %cst_13 : f32 to vector<8x128xf32>
    %23 = arith.addf %22, %21 : vector<8x128xf32>
    %24 = tpu.reciprocal %23 {approx = true} : vector<8x128xf32> -> vector<8x128xf32>
    %25 = arith.truncf %24 : vector<8x128xf32> to vector<8x128xbf16>
    %c0_14 = arith.constant 0 : index
    %c0_15 = arith.constant 0 : index
    %26 = vector.load %arg6[%c0_14, %c0_15] : memref<128x128xbf16, #tpu.memory_space<vmem>>, vector<128x128xbf16>
    %c0_16 = arith.constant 0 : index
    %c0_17 = arith.constant 0 : index
    %27 = vector.load %arg7[%c0_16, %c0_17] : memref<1x128xf32, #tpu.memory_space<vmem>>, vector<1x128xf32>
    %cst_18 = arith.constant dense<0.000000e+00> : vector<8x128xf32>
    %28 = tpu.matmul %25, %26, %cst_18 {dimension_numbers = #tpu.dot_dimension_numbers<[1], [0], [0], [1], [0, 0, 1, 1], [], []>} : vector<8x128xbf16>, vector<128x128xbf16>, vector<8x128xf32> -> vector<8x128xf32>
    %29 = vector.broadcast %27 : vector<1x128xf32> to vector<8x128xf32>
    %30 = arith.addf %28, %29 : vector<8x128xf32>
    %31 = arith.negf %30 : vector<8x128xf32>
    %32 = math.exp %31 : vector<8x128xf32>
    %cst_19 = arith.constant 1.000000e+00 : f32
    %33 = vector.broadcast %cst_19 : f32 to vector<8x128xf32>
    %34 = arith.addf %33, %32 : vector<8x128xf32>
    %35 = arith.divf %33, %34 : vector<8x128xf32>
    %c0_20 = arith.constant 0 : index
    %c0_21 = arith.constant 0 : index
    %36 = vector.load %arg8[%c0_20, %c0_21] : memref<8x128xf32, #tpu.memory_space<vmem>>, vector<8x128xf32>
    tpu.vector_store %arg8[%c0_20, %c0_21], %35 {strides = array<i32>} : memref<8x128xf32, #tpu.memory_space<vmem>>, vector<8x128xf32>,
    return
  }
  func.func @transform_0(%arg0: i32) -> (i32, i32) {
    %c0_i32 = arith.constant 0 : i32
    %c0_i32_0 = arith.constant 0 : i32
    return %arg0, %c0_i32 : i32, i32
  }
  func.func @transform_1(%arg0: i32) -> (i32, i32) {
    %c0_i32 = arith.constant 0 : i32
    %c0_i32_0 = arith.constant 0 : i32
    %c0_i32_1 = arith.constant 0 : i32
    return %c0_i32, %c0_i32_0 : i32, i32
  }
  func.func @transform_2(%arg0: i32) -> (i32, i32) {
    %c0_i32 = arith.constant 0 : i32
    %c0_i32_0 = arith.constant 0 : i32
    %c0_i32_1 = arith.constant 0 : i32
    return %c0_i32, %c0_i32_0 : i32, i32
  }
  func.func @transform_3(%arg0: i32) -> (i32, i32) {
    %c0_i32 = arith.constant 0 : i32
    %c0_i32_0 = arith.constant 0 : i32
    %c0_i32_1 = arith.constant 0 : i32
    return %c0_i32, %c0_i32_0 : i32, i32
  }
  func.func @transform_4(%arg0: i32) -> (i32, i32) {
    %c0_i32 = arith.constant 0 : i32
    %c0_i32_0 = arith.constant 0 : i32
    %c0_i32_1 = arith.constant 0 : i32
    return %c0_i32, %c0_i32_0 : i32, i32
  }
  func.func @transform_5(%arg0: i32) -> (i32, i32) {
    %c0_i32 = arith.constant 0 : i32
    %c0_i32_0 = arith.constant 0 : i32
    %c0_i32_1 = arith.constant 0 : i32
    return %c0_i32, %c0_i32_0 : i32, i32
  }
  func.func @transform_6(%arg0: i32) -> (i32, i32) {
    %c0_i32 = arith.constant 0 : i32
    %c0_i32_0 = arith.constant 0 : i32
    %c0_i32_1 = arith.constant 0 : i32
    return %c0_i32, %c0_i32_0 : i32, i32
  }
  func.func @transform_7(%arg0: i32) -> (i32, i32) {
    %c0_i32 = arith.constant 0 : i32
    %c0_i32_0 = arith.constant 0 : i32
    return %arg0, %c0_i32 : i32, i32
  }
}

</mosaic_0001>

<bundles_post_ra>
// kernel: my_classifier_forward.1
= control target key start
LH: loop header
LB: loop body
LE: loop exit
PB: predicated region body
PF: predicated region fallthrough
CT: control target
= control target key end

     0   :  { %12 = vsyncpa [#allocation3], 0  ;;  %s805_s0 = inlined_call_operand.hbm [shape: f32[8,32], index: 0, kind: input, shape index: {}]   ;;  %s806_s1 = inlined_call_operand.hbm [shape: bf16[32,128], index: 1, kind: input, shape index: {}]   ;;  %s807_s2 = inlined_call_operand.vmem [shape: f32[1,128], index: 2, kind: input, shape index: {}]   ;;  %s808_s3 = inlined_call_operand.hbm [shape: bf16[128,128], index: 3, kind: input, shape index: {}]   ;;  %s809_s4 = inlined_call_operand.vmem [shape: f32[1,128], index: 4, kind: input, shape index: {}]   ;;  %s810_s5 = inlined_call_operand.hbm [shape: bf16[128,128], index: 5, kind: input, shape index: {}]   ;;  %s811_s6 = inlined_call_operand.vmem [shape: f32[1,128], index: 6, kind: input, shape index: {}]   ;;  %s812_s7 = inlined_call_operand.hbm [shape: f32[8,128], index: 7, kind: output, shape index: {}]  }
   0x1   :  { %13 = vsyncpa [#allocation6], 0 }
   0x2   :  { %14 = vsyncpa [#allocation9], 0 }
   0x3   :  { %15 = vsyncpa [#allocation4], 0  ;;  %s657_s24 = smov [#allocation5]   ;;  %s539_s28 = scalar_lea.hbm %s806_s1, 256 }
   0x4   :  { %s31_s25 = sshll.u32 %s657_s24, 4  ;;  %p540_p0 = scmp.ne.s32.totalorder %s806_s1, %s539_s28  ;;  %s32_s25 = int_to_ptr.vmem [resolvable:$true] %s31_s25 }
   0x5   :  { %p543_p1 = scmp.lt.u32.totalorder %s539_s28, %s806_s1 }
   0x7   :  { %p545_p2 = pnand %p543_p1, %p540_p0 }
   0x9   :  { %548 = shalt.err (!%p545_p2)
}
   0xa   :  { %s549_s10 = scalar_lea.vmem %s32_s25, 256  ;;  %p554_p4 = scmp.lt.s32.totalorder %s32_s25, %s32_s25 }
   0xb   :  { %p550_p3 = scmp.ne.s32.totalorder %s32_s25, %s549_s10  ;;  %p555_p5 = scmp.lt.s32.totalorder %s549_s10, %s549_s10 }
   0xd   :  { %p556_p6 = por %p555_p5, %p554_p4 }
   0xf   :  { %p557_p7 = pnand %p556_p6, %p550_p3 }
  0x11   :  { %560 = shalt.err (!%p557_p7)
}
  0x12   :  { %s658_s11 = smov 64   ;;  %s659_s12 = smov 4  }
  0x13   :  { %37 = dma.hbm_to_vmem [thread:$0]  %s806_s1, 256, %s32_s25, [#allocation6], %s658_s11, %s658_s11, %s659_s12  }
  0x14   :  { %s660_s15 = smov [#allocation2]   ;;  %s661_s17 = smov [#allocation7]  }
  0x15   :  { %s22_s16 = sshll.u32 %s660_s15, 4  ;;  %s45_s18 = sshll.u32 %s661_s17, 4  ;;  %s23_s16 = int_to_ptr.vmem [resolvable:$true] %s22_s16  ;;  %s46_s18 = int_to_ptr.vmem [resolvable:$true] %s45_s18 }
  0x16   :  { %s561_s21 = scalar_lea.hbm %s805_s0, 128 }
  0x17   :  { %p562_p8 = scmp.ne.s32.totalorder %s805_s0, %s561_s21  ;;  %p565_p9 = scmp.lt.u32.totalorder %s561_s21, %s805_s0 }
  0x19   :  { %p567_p10 = pnand %p565_p9, %p562_p8 }
  0x1b   :  { %570 = shalt.err (!%p567_p10)
}
  0x1c   :  { %s571_s1 = scalar_lea.vmem %s23_s16, 128  ;;  %p576_p12 = scmp.lt.s32.totalorder %s23_s16, %s23_s16 }
  0x1d   :  { %p572_p11 = scmp.ne.s32.totalorder %s23_s16, %s571_s1  ;;  %p577_p13 = scmp.lt.s32.totalorder %s571_s1, %s571_s1 }
  0x1f   :  { %p578_p0 = por %p577_p13, %p576_p12 }
  0x21   :  { %p579_p1 = pnand %p578_p0, %p572_p11 }
  0x23   :  { %582 = shalt.err (!%p579_p1)
}
  0x24   :  { %25 = dma.hbm_to_vmem [thread:$0]  %s805_s0, 128, %s23_s16, [#allocation3]  }
  0x25   :  { %s583_s30 = scalar_lea.hbm %s808_s3, 1024 }
  0x26   :  { %p584_p2 = scmp.ne.s32.totalorder %s808_s3, %s583_s30  ;;  %p587_p3 = scmp.lt.u32.totalorder %s583_s30, %s808_s3 }
  0x28   :  { %p589_p4 = pnand %p587_p3, %p584_p2 }
  0x2a   :  { %592 = shalt.err (!%p589_p4)
}
  0x2b   :  { %s593_s14 = scalar_lea.vmem %s46_s18, 1024  ;;  %p598_p6 = scmp.lt.s32.totalorder %s46_s18, %s46_s18 }
  0x2c   :  { %p594_p5 = scmp.ne.s32.totalorder %s46_s18, %s593_s14  ;;  %p599_p7 = scmp.lt.s32.totalorder %s593_s14, %s593_s14 }
  0x2e   :  { %p600_p8 = por %p599_p7, %p598_p6 }
  0x30   :  { %p601_p9 = pnand %p600_p8, %p594_p5 }
  0x32   :  { %604 = shalt.err (!%p601_p9)
}
  0x33   :  { %51 = dma.hbm_to_vmem [thread:$0]  %s808_s3, 1024, %s46_s18, [#allocation6], %s658_s11, %s658_s11, %s659_s12  }
  0x34   :  { %s662_s16 = smov [#allocation8]   ;;  %s605_s21 = scalar_lea.hbm %s810_s5, 1024 }
  0x35   :  { %s59_s17 = sshll.u32 %s662_s16, 4  ;;  %p606_p10 = scmp.ne.s32.totalorder %s810_s5, %s605_s21  ;;  %s60_s17 = int_to_ptr.vmem [resolvable:$true] %s59_s17 }
  0x36   :  { %p609_p11 = scmp.lt.u32.totalorder %s605_s21, %s810_s5 }
  0x38   :  { %p611_p12 = pnand %p609_p11, %p606_p10 }
  0x3a   :  { %614 = shalt.err (!%p611_p12)
}
  0x3b   :  { %s615_s1 = scalar_lea.vmem %s60_s17, 1024  ;;  %p620_p0 = scmp.lt.s32.totalorder %s60_s17, %s60_s17 }
  0x3c   :  { %p616_p13 = scmp.ne.s32.totalorder %s60_s17, %s615_s1  ;;  %p621_p1 = scmp.lt.s32.totalorder %s615_s1, %s615_s1 }
  0x3e   :  { %p622_p2 = por %p621_p1, %p620_p0 }
  0x40   :  { %p623_p3 = pnand %p622_p2, %p616_p13 }
  0x42   :  { %626 = shalt.err (!%p623_p3)
}
  0x43   :  { %65 = dma.hbm_to_vmem [thread:$0]  %s810_s5, 1024, %s60_s17, [#allocation9], %s658_s11, %s658_s11, %s659_s12  }
  0x44   :  { %649 = dma.done.wait [#allocation3], 128  }
  0x45   :  { %650 = vsyncadd [#allocation3], 4294967168 }
  0x46   :  { %651 = dma.done.wait [#allocation6], 1280  }
  0x47   :  { %652 = vsyncadd [#allocation6], 4294966016 }
  0x48   :  { %653 = dma.done.wait [#allocation9], 1024  }
  0x49   :  { %654 = vsyncadd [#allocation9], 4294966272  ;;  %v663_v0 = vmov 0.0   ;;  %vm664_vm0 = vmmov 0   ;;  %v509_v1 = vld [vmem:[#allocation5] sm:$0xff]   ;;  %v510_v2 = vld [vmem:[#allocation5 + $0x8] sm:$0xff]  }
  0x4a   :  { %452 = vmatprep.subr.bf16.mxu0 %v663_v0  ;;  %456 = vmatprep.mubr.msk.bf16.mxu0 %vm664_vm0, %v663_v0  ;;  %v81_v3 = vld [vmem:[#allocation2] sm:$0xff]  ;;  %vm106_vm1 = vcmask 261120   ;;  %v511_v5 = vld [vmem:[#allocation7] sm:$0xff]   ;;  %v513_v7 = vld [vmem:[#allocation7 + $0x10] sm:$0xff]  }
  0x4b   :  { %460 = vmatprep.subr.bf16.mxu1 %v663_v0  ;;  %476 = vmatprep.mubr.msk.bf16.mxu1 %vm664_vm0, %v663_v0  ;;  %v82_v4 = vpack.c.bf16 %v81_v3, %v81_v3  ;;  %v512_v6 = vld [vmem:[#allocation7 + $0x8] sm:$0xff]   ;;  %v514_v8 = vld [vmem:[#allocation7 + $0x18] sm:$0xff]   ;;  %v515_v9 = vld [vmem:[#allocation7 + $0x20] sm:$0xff]  }
  0x4c   :  { %453 = vmatpush3.bf16.msra.mxu0 %v509_v1  ;;  %461 = vmatpush3.bf16.msra.mxu1 %v511_v5  ;;  %v516_v10 = vld [vmem:[#allocation7 + $0x28] sm:$0xff]   ;;  %v517_v11 = vld [vmem:[#allocation7 + $0x30] sm:$0xff]   ;;  %v518_v12 = vld [vmem:[#allocation7 + $0x38] sm:$0xff]  }
  0x4d   :  { %454 = vmatprep.subr.bf16.mxu0 %v663_v0  ;;  %462 = vmatprep.subr.bf16.mxu1 %v663_v0  ;;  %v408_v13 = vld [vmem:[%s807_s2] ss:$0 sm:$0xff]  ;;  %v519_v25 = vld [vmem:[#allocation8] sm:$0xff]   ;;  %v521_v27 = vld [vmem:[#allocation8 + $0x10] sm:$0xff]  }
  0x4e   :  { %v520_v26 = vld [vmem:[#allocation8 + $0x8] sm:$0xff]   ;;  %v522_v28 = vld [vmem:[#allocation8 + $0x18] sm:$0xff]   ;;  %v523_v29 = vld [vmem:[#allocation8 + $0x20] sm:$0xff]  }
  0x4f   :  { %v524_v30 = vld [vmem:[#allocation8 + $0x28] sm:$0xff]   ;;  %v525_v31 = vld [vmem:[#allocation8 + $0x30] sm:$0xff]   ;;  %v526_v32 = vld [vmem:[#allocation8 + $0x38] sm:$0xff]  }
  0x50   :  { %455 = vmatpush3.bf16.msra.mxu0 %v510_v2  ;;  %463 = vmatpush3.bf16.msra.mxu1 %v512_v6  ;;  %v412_v33 = vld [vmem:[%s809_s4] ss:$0 sm:$0xff]  ;;  %s665_s4 = smov [#allocation10]  }
  0x51   :  { %480 = vmatprep.subr.bf16.mxu0 %v663_v0  ;;  %464 = vmatprep.subr.bf16.mxu1 %v663_v0  ;;  %v421_v45 = vld [vmem:[%s811_s6] ss:$0 sm:$0xff]  ;;  %s397_s28 = sshll.u32 %s665_s4, 4  ;;  %s398_s28 = int_to_ptr.vmem [resolvable:$true] %s397_s28 }
  0x52   :  { %s627_s29 = scalar_lea.vmem %s398_s28, 128  ;;  %p632_p5 = scmp.lt.s32.totalorder %s398_s28, %s398_s28 }
  0x53   :  { %457 = vmatmul.mubr.msk.bf16.vlgmr.msra.gmra.mrb[0].mxu0 %vm106_vm1, %v82_v4  ;;  %p628_p4 = scmp.ne.s32.totalorder %s398_s28, %s627_s29  ;;  %p633_p6 = scmp.lt.s32.totalorder %s627_s29, %s627_s29 }
  0x54   :  { %496 = vmatprep.mubr.msk.bf16.mxu0 %vm664_vm0, %v663_v0  ;;  %465 = vmatpush3.bf16.msra.mxu1 %v513_v7 }
  0x55   :  { %466 = vmatprep.subr.bf16.mxu1 %v663_v0  ;;  %481 = vmatpush3.bf16.msra.mxu0 %v519_v25  ;;  %p634_p7 = por %p633_p6, %p632_p5 }
  0x56   :  { %482 = vmatprep.subr.bf16.mxu0 %v663_v0 }
  0x57   :  { %p635_p8 = pnand %p634_p7, %p628_p4 }
  0x58   :  { %467 = vmatpush3.bf16.msra.mxu1 %v514_v8 }
  0x59   :  { %468 = vmatprep.subr.bf16.mxu1 %v663_v0  ;;  %483 = vmatpush3.bf16.msra.mxu0 %v520_v26 }
  0x5a   :  { %484 = vmatprep.subr.bf16.mxu0 %v663_v0 }
  0x5c   :  { %469 = vmatpush3.bf16.msra.mxu1 %v515_v9 }
  0x5d   :  { %470 = vmatprep.subr.bf16.mxu1 %v663_v0  ;;  %485 = vmatpush3.bf16.msra.mxu0 %v521_v27 }
  0x5e   :  { %486 = vmatprep.subr.bf16.mxu0 %v663_v0 }
  0x60   :  { %471 = vmatpush3.bf16.msra.mxu1 %v516_v10 }
  0x61   :  { %472 = vmatprep.subr.bf16.mxu1 %v663_v0  ;;  %487 = vmatpush3.bf16.msra.mxu0 %v522_v28 }
  0x62   :  { %488 = vmatprep.subr.bf16.mxu0 %v663_v0 }
  0x64   :  { %473 = vmatpush3.bf16.msra.mxu1 %v517_v11 }
  0x65   :  { %474 = vmatprep.subr.bf16.mxu1 %v663_v0  ;;  %489 = vmatpush3.bf16.msra.mxu0 %v523_v29 }
  0x66   :  { %490 = vmatprep.subr.bf16.mxu0 %v663_v0 }
  0x68   :  { %475 = vmatpush3.bf16.msra.mxu1 %v518_v12 }
  0x69   :  { %491 = vmatpush3.bf16.msra.mxu0 %v524_v30 }
  0x6a   :  { %492 = vmatprep.subr.bf16.mxu0 %v663_v0 }
  0x6d   :  { %493 = vmatpush3.bf16.msra.mxu0 %v525_v31 }
  0x6e   :  { %494 = vmatprep.subr.bf16.mxu0 %v663_v0 }
  0x71   :  { %495 = vmatpush3.bf16.msra.mxu0 %v526_v32 }
 0x126   :  { %v144_v14 = vpop.f32.mrb[0].mxu0 }
 0x127   :  { %v145_v15 = vadd.f32 %v408_v13, %v144_v14  ;;  %v458_v16 = vpop.f32.mrb[1].mxu0 }
 0x128   :  { %v147_v17 = vpop.f32.mrb[2].mxu0 }
 0x129   :  { %v150_v18 = vsub.f32 0.0, %v145_v15  ;;  %v459_v19 = vpop.f32.mrb[3].mxu0 }
 0x12b   :  { %v151_v20 = vmul.f32 1.442695, %v150_v18 }
 0x12d   :  { %527 = vpow2.f32 %v151_v20 }
 0x137   :  { %v528_v21 = vpop.eup %527 }
 0x138   :  { %v153_v22 = vadd.f32 1.0, %v528_v21 }
 0x13a   :  { %529 = vrcp.f32 %v153_v22 }
 0x144   :  { %v530_v23 = vpop.eup %529 }
 0x145   :  { %v155_v24 = vpack.c.bf16 %v530_v23, %v530_v23 }
 0x147   :  { %477 = vmatmul.mubr.bf16.vlgmr.msra.gmra.mrb[0].mxu1 %v155_v24 }
 0x21a   :  { %v261_v34 = vpop.f32.mrb[0].mxu1 }
 0x21b   :  { %v262_v35 = vadd.f32 %v412_v33, %v261_v34  ;;  %v478_v36 = vpop.f32.mrb[1].mxu1 }
 0x21c   :  { %v264_v37 = vpop.f32.mrb[2].mxu1 }
 0x21d   :  { %v267_v38 = vsub.f32 0.0, %v262_v35  ;;  %v479_v39 = vpop.f32.mrb[3].mxu1 }
 0x21f   :  { %v268_v40 = vmul.f32 1.442695, %v267_v38 }
 0x221   :  { %531 = vpow2.f32 %v268_v40 }
 0x22b   :  { %v532_v41 = vpop.eup %531 }
 0x22c   :  { %v270_v42 = vadd.f32 1.0, %v532_v41 }
 0x22e   :  { %533 = vrcp.f32 %v270_v42 }
 0x238   :  { %v534_v43 = vpop.eup %533 }
 0x239   :  { %v272_v44 = vpack.c.bf16 %v534_v43, %v534_v43 }
 0x23b   :  { %497 = vmatmul.mubr.bf16.vlgmr.msra.gmra.mrb[4].mxu0 %v272_v44 }
 0x30e   :  { %v378_v46 = vpop.f32.mrb[4].mxu0 }
 0x30f   :  { %v379_v47 = vadd.f32 %v421_v45, %v378_v46  ;;  %v498_v48 = vpop.f32.mrb[5].mxu0 }
 0x310   :  { %v381_v49 = vpop.f32.mrb[6].mxu0 }
 0x311   :  { %v430_v50 = vmul.f32 -1.442695, %v379_v47  ;;  %v499_v51 = vpop.f32.mrb[7].mxu0 }
 0x313   :  { %535 = vpow2.f32 %v430_v50 }
 0x31d   :  { %v536_v52 = vpop.eup %535 }
 0x31e   :  { %v387_v53 = vadd.f32 1.0, %v536_v52 }
 0x320   :  { %537 = vrcp.f32 %v387_v53 }
 0x32a   :  { %v538_v54 = vpop.eup %537 }
 0x32b   :  { %390 = vst [vmem:[#allocation10] sm:$0xff] %v538_v54 }
 0x32c   :  { %638 = shalt.err (!%p635_p8)
}
 0x32d   :  { %s639_s8 = scalar_lea.hbm %s812_s7, 128 }
 0x32e   :  { %p640_p9 = scmp.ne.s32.totalorder %s812_s7, %s639_s8  ;;  %p643_p10 = scmp.lt.u32.totalorder %s639_s8, %s812_s7 }
 0x330   :  { %p645_p11 = pnand %p643_p10, %p640_p9 }
 0x332   :  { %648 = shalt.err (!%p645_p11)
}
 0x333   :  { %400 = dma.vmem_to_hbm [thread:$0]  %s398_s28, 128, %s812_s7, [#allocation4]  }
 0x334   :  { %655 = dma.done.wait [#allocation4], 128  }
 0x335   :  { %656 = vsyncadd [#allocation4], 4294967168 }
 0x336   :  { %404 = vsyncpa [#allocation3], 1 }
 0x337   :  { %405 = vsyncpa [#allocation6], 1 }
 0x338   :  { %406 = vsyncpa [#allocation9], 1 }
 0x339   :  { %407 = vsyncpa [#allocation4], 1 }

</bundles_post_ra>
